<compile_context>
chip_gen: v7x
topology: tpu7x:2x2x1
jax: 0.10.0
libtpu: 0.0.40
codegen_flags: <defaults>
</compile_context>

<pallas_src>
import functools

import jax
import jax.numpy as jnp
from jax import lax
from jax.experimental import pallas as pl
from jax.experimental.pallas import tpu as pltpu

LANES = 128
ACC_ROWS = 8                            # sublane height of the lane-dense partial sums
CHUNK_ROWS = 1024                       # inner accumulation chunk (multiple of 32)
TARGET_BLOCK_BYTES = 4 * 1024 * 1024    # per-input HBM->VMEM block target
VMEM_LIMIT_BYTES = 40 * 1024 * 1024     # 2 inputs x 2 bufs x 4 MiB + temps << 40 MiB


def _round_up(x, m):
    return ((x + m - 1) // m) * m


def _mse_sum_kernel(p_ref, t_ref, out_ref, *, tile_rows, chunk_rows, n_rows,
                    n_blocks, blocks_per_core, last_partial):
    c = pl.program_id(0)     # core-split axis ("parallel")
    j = pl.program_id(1)     # streaming / reduction axis ("arbitrary")

    @pl.when(j == 0)
    def _():
        out_ref[...] = jnp.zeros_like(out_ref)

    block_id = c * blocks_per_core + j
    n_chunks = tile_rows // chunk_rows

    def chunk_sum(i, rows_valid):
        """Sum of squared diffs over block rows [i*chunk_rows, (i+1)*chunk_rows)."""
        off = i * chunk_rows
        if not isinstance(off, int):
            off = pl.multiple_of(off, chunk_rows)
        d = (p_ref[pl.ds(off, chunk_rows), :].astype(jnp.float32)
             - t_ref[pl.ds(off, chunk_rows), :].astype(jnp.float32))
        sq = d * d
        if rows_valid is not None:
            # Only the single partial last block pays for the mask; out-of-range
            # rows may hold garbage (NaN/Inf), so they are excluded by where().
            row = lax.broadcasted_iota(jnp.int32, (chunk_rows, LANES), 0)
            sq = jnp.where(off + row < rows_valid, sq, 0.0)
        # Lane-dense fold onto (8, 128): pure VPU adds, no per-step XLU reduce.
        return jnp.sum(sq.reshape(-1, ACC_ROWS, LANES), axis=0)

    def block_sum(rows_valid):
        if n_chunks == 1:
            return chunk_sum(0, rows_valid)
        return lax.fori_loop(
            0, n_chunks,
            lambda i, acc: acc + chunk_sum(i, rows_valid),
            jnp.zeros((ACC_ROWS, LANES), jnp.float32))

    if not last_partial:
        out_ref[0] += block_sum(None)
    elif n_blocks == 1:
        out_ref[0] += block_sum(n_rows)
    else:
        is_edge = block_id == n_blocks - 1

        @pl.when(jnp.logical_not(is_edge))
        def _():
            out_ref[0] += block_sum(None)          # hot path: no mask work at all

        @pl.when(is_edge)
        def _():
            out_ref[0] += block_sum(n_rows - block_id * tile_rows)


def _mse_partial_sums(p2, t2, *, tile_rows, chunk_rows, n_rows, n_blocks,
                      num_splits, blocks_per_core, last_partial):
    kernel = functools.partial(
        _mse_sum_kernel,
        tile_rows=tile_rows, chunk_rows=chunk_rows, n_rows=n_rows,
        n_blocks=n_blocks, blocks_per_core=blocks_per_core,
        last_partial=last_partial)

    def in_map(c, j):
        return (c * blocks_per_core + j, 0)

    return pl.pallas_call(
        kernel,
        out_shape=jax.ShapeDtypeStruct((num_splits, ACC_ROWS, LANES), jnp.float32),
        grid=(num_splits, blocks_per_core),
        in_specs=[
            pl.BlockSpec((tile_rows, LANES), in_map),
            pl.BlockSpec((tile_rows, LANES), in_map),
        ],
        out_specs=pl.BlockSpec((1, ACC_ROWS, LANES), lambda c, j: (c, 0, 0)),
        compiler_params=pltpu.CompilerParams(
            # TODO(synk): on v7x, verify in the trace that the leading axis
            # actually shards across both TensorCores; if it lowers to a serial
            # loop, switch it to pltpu.CORE_PARALLEL.
            dimension_semantics=("parallel", "arbitrary"),
            vmem_limit_bytes=VMEM_LIMIT_BYTES),
    )(p2, t2)


def mse_loss_pallas(pred, target):
    """Pallas equivalent of nn.MSELoss()(pred, target) with 'mean' reduction."""
    if pred.shape != target.shape:
        target = target.reshape(-1)      # matches the module's target.view(-1) path
    n = pred.size
    if target.size != n:
        raise ValueError(
            f"pred {pred.shape} and target {target.shape} must have the same "
            "number of elements")

    p = pred.reshape(-1)
    t = target.reshape(-1)

    # Tail handling without jnp.pad: the <128-element remainder is reduced by a
    # tiny XLA op; only the lane-aligned prefix streams through the kernel.
    tail = n % LANES
    n_full = n - tail
    if tail:
        tail_sum = jnp.sum(
            (p[n_full:].astype(jnp.float32) - t[n_full:].astype(jnp.float32)) ** 2)
    else:
        tail_sum = jnp.float32(0.0)

    if n_full == 0:
        # Fewer than 128 elements total: nothing for the kernel to stream.
        return tail_sum / jnp.float32(n)

    if tail:
        p = p[:n_full]
        t = t[:n_full]
    n_rows = n_full // LANES
    p2 = p.reshape(n_rows, LANES)
    t2 = t.reshape(n_rows, LANES)

    # Byte-based block sizing: keep per-step DMA bytes ~TARGET_BLOCK_BYTES per
    # input regardless of dtype (bf16 gets 2x the rows of f32).
    itemsize = max(p2.dtype.itemsize, t2.dtype.itemsize)
    packing = max(1, 4 // min(p2.dtype.itemsize, t2.dtype.itemsize))
    max_rows = max(CHUNK_ROWS,
                   (TARGET_BLOCK_BYTES // (LANES * itemsize)) // CHUNK_ROWS * CHUNK_ROWS)

    rounded = _round_up(n_rows, ACC_ROWS * packing)
    if rounded <= CHUNK_ROWS:
        tile_rows = rounded              # whole input in one small block / chunk
        chunk_rows = tile_rows
    else:
        tile_rows = min(max_rows, _round_up(n_rows, CHUNK_ROWS))
        chunk_rows = CHUNK_ROWS

    n_blocks = (n_rows + tile_rows - 1) // tile_rows
    last_partial = (n_rows % tile_rows) != 0

    # 2-way TensorCore split only when it costs nothing: an even block count
    # means no clamped / duplicate (fully masked) block on either core.
    num_splits = 2 if (n_blocks >= 2 and n_blocks % 2 == 0) else 1
    blocks_per_core = n_blocks // num_splits

    partials = _mse_partial_sums(
        p2, t2, tile_rows=tile_rows, chunk_rows=chunk_rows, n_rows=n_rows,
        n_blocks=n_blocks, num_splits=num_splits,
        blocks_per_core=blocks_per_core, last_partial=last_partial)

    # One cheap cross-lane reduction over the tiny partial-sum slab.
    return (jnp.sum(partials) + tail_sum) / jnp.float32(n)


def mean_squared_error_loss(outputs, batch):
    """Mirror of MeanSquaredErrorLoss.forward (device move is a no-op in JAX)."""
    pred = outputs["outputs"]
    target = batch["targets"]
    loss = mse_loss_pallas(pred, target)
    # Keep the JAX scalar (no blocking device->host .item() on the hot path);
    # callers can convert lazily when logging.
    loss_dict = {"MSE": loss}
    return loss, loss_dict


if __name__ == "__main__":
    key = jax.random.PRNGKey(0)
    keys = jax.random.split(key, 8)

    # Primary small NCHW-like case (typical use of the module).
    pred = jax.random.normal(keys[0], (2, 4, 16, 16), dtype=jnp.float32)
    target = jax.random.normal(keys[1], (2, 4, 16, 16), dtype=jnp.float32)
    loss, loss_dict = mean_squared_error_loss({"outputs": pred}, {"targets": target})
    loss = jax.block_until_ready(loss)
    ref = jnp.mean((pred - target) ** 2)
    assert jnp.allclose(loss, ref, rtol=1e-6, atol=1e-6), (loss, ref)
    assert jnp.allclose(loss_dict["MSE"], ref, rtol=1e-6, atol=1e-6)

    # Odd element count + mismatched shapes -> wrapper tail path + masked block.
    p_odd = jax.random.normal(keys[2], (3, 5, 7, 11), dtype=jnp.float32)
    t_odd = jax.random.normal(keys[3], (3 * 5 * 7 * 11,), dtype=jnp.float32)
    l_odd = jax.block_until_ready(mse_loss_pallas(p_odd, t_odd))
    r_odd = jnp.mean((p_odd.reshape(-1) - t_odd) ** 2)
    assert jnp.allclose(l_odd, r_odd, rtol=1e-6, atol=1e-6), (l_odd, r_odd)

    # Larger case -> multi-block streaming, even 2-way split, partial edge
    # block (masked only under pl.when) and the chunked inner fori_loop.
    p_big = jax.random.normal(keys[4], (2, 4, 512, 260), dtype=jnp.float32)
    t_big = jax.random.normal(keys[5], (2, 4, 512, 260), dtype=jnp.float32)
    l_big = jax.block_until_ready(mse_loss_pallas(p_big, t_big))
    r_big = jnp.mean((p_big - t_big) ** 2)
    assert jnp.allclose(l_big, r_big, rtol=1e-5, atol=1e-6), (l_big, r_big)

    # bf16 inputs stay bf16 in HBM and are upcast in-register inside the kernel.
    p_bf = jax.random.normal(keys[6], (4, 8, 64), dtype=jnp.bfloat16)
    t_bf = jax.random.normal(keys[7], (4, 8, 64), dtype=jnp.bfloat16)
    l_bf = jax.block_until_ready(mse_loss_pallas(p_bf, t_bf))
    r_bf = jnp.mean((p_bf.astype(jnp.float32) - t_bf.astype(jnp.float32)) ** 2)
    assert jnp.allclose(l_bf, r_bf, rtol=1e-2, atol=1e-3), (l_bf, r_bf)

    print("KERNEL_OK")
</pallas_src>

<mosaic_0001>
module attributes {stable_mosaic.version = 11 : i64} {
  func.func @_mse_sum_kernel(%arg0: i32, %arg1: i32, %arg2: memref<16x128xf32, #tpu.memory_space<vmem>>, %arg3: memref<16x128xf32, #tpu.memory_space<vmem>>, %arg4: memref<1x8x128xf32, #tpu.memory_space<vmem>>) attributes {dimension_semantics = [#tpu.dimension_semantics<parallel>, #tpu.dimension_semantics<arbitrary>], iteration_bounds = array<i64: 1, 1>, scalar_prefetch = 0 : i64, scratch_operands = 0 : i64, tpu.core_type = #tpu.core_type<tc>, window_params = [{transform_indices = @transform_0, window_bounds = array<i64: 16, 128>}, {transform_indices = @transform_1, window_bounds = array<i64: 16, 128>}, {transform_indices = @transform_2, window_bounds = array<i64: 1, 8, 128>}]} {
    %c0_i32 = arith.constant 0 : i32
    %0 = arith.cmpi eq, %arg1, %c0_i32 : i32
    %1 = arith.extui %0 : i1 to i32
    %c0_i32_0 = arith.constant 0 : i32
    %2 = arith.cmpi ne, %1, %c0_i32_0 : i32
    scf.if %2 {
      %cst_10 = arith.constant 0.000000e+00 : f32
      %15 = vector.broadcast %cst_10 : f32 to vector<1x8x128xf32>
      %c0_11 = arith.constant 0 : index
      %c0_12 = arith.constant 0 : index
      %c0_13 = arith.constant 0 : index
      %16 = vector.load %arg4[%c0_11, %c0_12, %c0_13] : memref<1x8x128xf32, #tpu.memory_space<vmem>>, vector<1x8x128xf32>
      tpu.vector_store %arg4[%c0_11, %c0_12, %c0_13], %15 {strides = array<i32>} : memref<1x8x128xf32, #tpu.memory_space<vmem>>, vector<1x8x128xf32>,
    } else {
    }
    %c0 = arith.constant 0 : index
    %c0_1 = arith.constant 0 : index
    %c0_2 = arith.constant 0 : index
    %3 = vector.load %arg4[%c0, %c0_1, %c0_2] : memref<1x8x128xf32, #tpu.memory_space<vmem>>, vector<1x8x128xf32>
    %4 = vector.shape_cast %3 : vector<1x8x128xf32> to vector<8x128xf32>
    %c0_3 = arith.constant 0 : index
    %c0_4 = arith.constant 0 : index
    %5 = vector.load %arg2[%c0_3, %c0_4] : memref<16x128xf32, #tpu.memory_space<vmem>>, vector<16x128xf32>
    %c0_5 = arith.constant 0 : index
    %c0_6 = arith.constant 0 : index
    %6 = vector.load %arg3[%c0_5, %c0_6] : memref<16x128xf32, #tpu.memory_space<vmem>>, vector<16x128xf32>
    %7 = arith.subf %5, %6 : vector<16x128xf32>
    %8 = arith.mulf %7, %7 : vector<16x128xf32>
    %9 = vector.shape_cast %8 : vector<16x128xf32> to vector<2x8x128xf32>
    %cst = arith.constant dense<0.000000e+00> : vector<8x128xf32>
    %10 = vector.multi_reduction <add>, %9, %cst [0] : vector<2x8x128xf32> to vector<8x128xf32>
    %11 = arith.addf %4, %10 : vector<8x128xf32>
    %c0_7 = arith.constant 0 : index
    %c0_8 = arith.constant 0 : index
    %c0_9 = arith.constant 0 : index
    %12 = vector.load %arg4[%c0_7, %c0_8, %c0_9] : memref<1x8x128xf32, #tpu.memory_space<vmem>>, vector<1x8x128xf32>
    %13 = vector.shape_cast %12 : vector<1x8x128xf32> to vector<8x128xf32>
    %14 = vector.shape_cast %11 : vector<8x128xf32> to vector<1x8x128xf32>
    tpu.vector_store %arg4[%c0_7, %c0_8, %c0_9], %14 {strides = array<i32>} : memref<1x8x128xf32, #tpu.memory_space<vmem>>, vector<1x8x128xf32>,
    return
  }
  func.func @transform_0(%arg0: i32, %arg1: i32) -> (i32, i32) {
    %c1_i32 = arith.constant 1 : i32
    %0 = arith.muli %arg0, %c1_i32 : i32
    %1 = arith.addi %0, %arg1 : i32
    %c0_i32 = arith.constant 0 : i32
    %c0_i32_0 = arith.constant 0 : i32
    return %1, %c0_i32 : i32, i32
  }
  func.func @transform_1(%arg0: i32, %arg1: i32) -> (i32, i32) {
    %c1_i32 = arith.constant 1 : i32
    %0 = arith.muli %arg0, %c1_i32 : i32
    %1 = arith.addi %0, %arg1 : i32
    %c0_i32 = arith.constant 0 : i32
    %c0_i32_0 = arith.constant 0 : i32
    return %1, %c0_i32 : i32, i32
  }
  func.func @transform_2(%arg0: i32, %arg1: i32) -> (i32, i32, i32) {
    %c0_i32 = arith.constant 0 : i32
    %c0_i32_0 = arith.constant 0 : i32
    %c0_i32_1 = arith.constant 0 : i32
    return %arg0, %c0_i32, %c0_i32_0 : i32, i32, i32
  }
}

</mosaic_0001>

<bundles_post_ra>
// kernel: tpu_custom_call.1
= control target key start
LH: loop header
LB: loop body
LE: loop exit
PB: predicated region body
PF: predicated region fallthrough
CT: control target
= control target key end

     0   :  { %7 = vsyncpa [#allocation3], 0  ;;  %s219_s0 = inlined_call_operand.hbm [shape: f32[16,128], index: 0, kind: input, shape index: {}]   ;;  %s220_s1 = inlined_call_operand.hbm [shape: f32[16,128], index: 1, kind: input, shape index: {}]   ;;  %s221_s2 = inlined_call_operand.hbm [shape: f32[1,8,128], index: 2, kind: output, shape index: {}]  }
   0x1   :  { %8 = vsyncpa [#allocation6], 0 }
   0x2   :  { %9 = vsyncpa [#allocation4], 0  ;;  %s163_s9 = smov [#allocation2]   ;;  %s91_s13 = scalar_lea.hbm %s219_s0, 256 }
   0x3   :  { %s19_s10 = sshll.u32 %s163_s9, 4  ;;  %p92_p0 = scmp.ne.s32.totalorder %s219_s0, %s91_s13  ;;  %s20_s10 = int_to_ptr.vmem [resolvable:$true] %s19_s10 }
   0x4   :  { %p95_p1 = scmp.lt.u32.totalorder %s91_s13, %s219_s0 }
   0x6   :  { %p97_p2 = pnand %p95_p1, %p92_p0 }
   0x8   :  { %100 = shalt.err (!%p97_p2)
}
   0x9   :  { %s101_s18 = scalar_lea.vmem %s20_s10, 256  ;;  %p106_p4 = scmp.lt.s32.totalorder %s20_s10, %s20_s10 }
   0xa   :  { %p102_p3 = scmp.ne.s32.totalorder %s20_s10, %s101_s18  ;;  %p107_p5 = scmp.lt.s32.totalorder %s101_s18, %s101_s18 }
   0xc   :  { %p108_p6 = por %p107_p5, %p106_p4 }
   0xe   :  { %p109_p7 = pnand %p108_p6, %p102_p3 }
  0x10   :  { %112 = shalt.err (!%p109_p7)
}
  0x11   :  { %s164_s19 = smov 128   ;;  %s165_s20 = smov 8  }
  0x12   :  { %25 = dma.hbm_to_vmem [thread:$0]  %s219_s0, 256, %s20_s10, [#allocation3], %s164_s19, %s164_s19, %s165_s20  }
  0x13   :  { %s166_s23 = smov [#allocation5]   ;;  %s113_s27 = scalar_lea.hbm %s220_s1, 256 }
  0x14   :  { %s35_s24 = sshll.u32 %s166_s23, 4  ;;  %p114_p8 = scmp.ne.s32.totalorder %s220_s1, %s113_s27  ;;  %s36_s24 = int_to_ptr.vmem [resolvable:$true] %s35_s24 }
  0x15   :  { %p117_p9 = scmp.lt.u32.totalorder %s113_s27, %s220_s1 }
  0x17   :  { %p119_p10 = pnand %p117_p9, %p114_p8 }
  0x19   :  { %122 = shalt.err (!%p119_p10)
}
  0x1a   :  { %s123_s4 = scalar_lea.vmem %s36_s24, 256  ;;  %p128_p12 = scmp.lt.s32.totalorder %s36_s24, %s36_s24 }
  0x1b   :  { %p124_p11 = scmp.ne.s32.totalorder %s36_s24, %s123_s4  ;;  %p129_p13 = scmp.lt.s32.totalorder %s123_s4, %s123_s4 }
  0x1d   :  { %p130_p0 = por %p129_p13, %p128_p12 }
  0x1f   :  { %p131_p1 = pnand %p130_p0, %p124_p11 }
  0x21   :  { %134 = shalt.err (!%p131_p1)
}
  0x22   :  { %41 = dma.hbm_to_vmem [thread:$0]  %s220_s1, 256, %s36_s24, [#allocation6], %s164_s19, %s164_s19, %s165_s20  }
  0x23   :  { %157 = dma.done.wait [#allocation3], 256  }
  0x24   :  { %158 = vsyncadd [#allocation3], 4294967040 }
  0x25   :  { %159 = dma.done.wait [#allocation6], 256  }
  0x26   :  { %160 = vsyncadd [#allocation6], 4294967040  ;;  %v58_v0 = vld [vmem:[#allocation2] sm:$0xff]  ;;  %v59_v1 = vld [vmem:[#allocation2 + $0x8] sm:$0xff]  ;;  %s167_s6 = smov [#allocation7]  }
  0x27   :  { %v60_v2 = vld [vmem:[#allocation5] sm:$0xff]  ;;  %v61_v3 = vld [vmem:[#allocation5 + $0x8] sm:$0xff]  ;;  %s75_s7 = sshll.u32 %s167_s6, 4  ;;  %s76_s7 = int_to_ptr.vmem [resolvable:$true] %s75_s7 }
  0x28   :  { %v62_v4 = vsub.f32 %v58_v0, %v60_v2  ;;  %v63_v5 = vsub.f32 %v59_v1, %v61_v3  ;;  %s135_s8 = scalar_lea.vmem %s76_s7, 128  ;;  %p140_p3 = scmp.lt.s32.totalorder %s76_s7, %s76_s7 }
  0x29   :  { %p136_p2 = scmp.ne.s32.totalorder %s76_s7, %s135_s8  ;;  %p141_p4 = scmp.lt.s32.totalorder %s135_s8, %s135_s8 }
  0x2a   :  { %v64_v6 = vmul.f32 %v62_v4, %v62_v4  ;;  %v65_v7 = vmul.f32 %v63_v5, %v63_v5 }
  0x2b   :  { %p142_p5 = por %p141_p4, %p140_p3 }
  0x2c   :  { %v66_v8 = vadd.f32 %v65_v7, %v64_v6 }
  0x2d   :  { %p143_p6 = pnand %p142_p5, %p136_p2 }
  0x2e   :  { %68 = vst [vmem:[#allocation7] sm:$0xff] %v66_v8 }
  0x2f   :  { %146 = shalt.err (!%p143_p6)
}
  0x30   :  { %s147_s10 = scalar_lea.hbm %s221_s2, 128 }
  0x31   :  { %p148_p7 = scmp.ne.s32.totalorder %s221_s2, %s147_s10  ;;  %p151_p8 = scmp.lt.u32.totalorder %s147_s10, %s221_s2 }
  0x33   :  { %p153_p9 = pnand %p151_p8, %p148_p7 }
  0x35   :  { %156 = shalt.err (!%p153_p9)
}
  0x36   :  { %78 = dma.vmem_to_hbm [thread:$0]  %s76_s7, 128, %s221_s2, [#allocation4]  }
  0x37   :  { %161 = dma.done.wait [#allocation4], 128  }
  0x38   :  { %162 = vsyncadd [#allocation4], 4294967168 }
  0x39   :  { %82 = vsyncpa [#allocation3], 1 }
  0x3a   :  { %83 = vsyncpa [#allocation6], 1 }
  0x3b   :  { %84 = vsyncpa [#allocation4], 1 }

</bundles_post_ra>
